<compile_context>
chip_gen: v6e
topology: v6e:2x2x1
jax: 0.10.0
libtpu: 0.0.40
codegen_flags: <defaults>
</compile_context>

<pallas_src>
import functools

import numpy as np
import jax
import jax.numpy as jnp
from jax.experimental import pallas as pl
from jax.experimental.pallas import tpu as pltpu


BEGIN, INNER, OUT = 1, 2, 0


def _round_up(x, m):
    return (x + m - 1) // m * m


# --------------------------------- kernel ----------------------------------


def _entity_head_kernel(span_ref, w1_ref, b1_ref, emb_ref, alpha_ref,
                        pseudo_sc, m_sc, l_sc,
                        *, tv, v_actual, v_padded, compute_dtype, approx_recip):
    # span_ref : (TM, 2*D)     VMEM, compute_dtype
    # w1_ref   : (2*D, d_ent)  VMEM, compute_dtype (transposed nn.Linear weight)
    # b1_ref   : (1, d_ent)    VMEM, f32
    # emb_ref  : (d_ent, TV)   VMEM, compute_dtype (entity_embedding.weight tile)
    # alpha_ref: (TM, TV)      VMEM, f32 output tile
    # pseudo_sc: (TM, d_ent)   f32 scratch, persists across the phase/V axes
    # m_sc,l_sc: (TM, 1)       f32 scratch, running max / running sum of exp
    p = pl.program_id(1)   # phase: 0 = stats sweep, 1 = write sweep
    v = pl.program_id(2)   # V tile index

    @pl.when((p == 0) & (v == 0))
    def _init():
        # Hoisted: computed once per M tile, reused for every V tile / phase.
        pseudo_sc[...] = (
            jnp.dot(span_ref[...], w1_ref[...], preferred_element_type=jnp.float32)
            + b1_ref[...]
        )
        m_sc[...] = jnp.full_like(m_sc, -jnp.inf)
        l_sc[...] = jnp.zeros_like(l_sc)

    def _scores():
        s = jnp.dot(pseudo_sc[...].astype(compute_dtype), emb_ref[...],
                    preferred_element_type=jnp.float32)
        if v_padded != v_actual:  # static: mask the zero-padded vocab columns
            col = v * tv + jax.lax.broadcasted_iota(jnp.int32, s.shape, 1)
            s = jnp.where(col < v_actual, s, -jnp.inf)
        return s

    @pl.when(p == 0)
    def _stats_pass():
        s = _scores()
        m_new = jnp.maximum(m_sc[...], jnp.max(s, axis=-1, keepdims=True))
        l_sc[...] = (l_sc[...] * jnp.exp(m_sc[...] - m_new)
                     + jnp.sum(jnp.exp(s - m_new), axis=-1, keepdims=True))
        m_sc[...] = m_new

    @pl.when(p == 1)
    def _write_pass():
        s = _scores()
        e = jnp.exp(s - m_sc[...])
        if approx_recip:
            inv_l = pl.reciprocal(l_sc[...], approx=True)   # EUP slot, VPU-free
        else:
            inv_l = 1.0 / l_sc[...]
        alpha_ref[...] = (e * inv_l).astype(alpha_ref.dtype)


def entity_prediction_head_alpha(mention_span, w1_t, b1, entity_emb_weight, *,
                                 compute_dtype=jnp.bfloat16,
                                 tm_target=128, tv_target=512):
    """mention_span: (M, 2*D); w1_t: (2*D, d_ent); b1: (d_ent,);
    entity_emb_weight: (d_ent, V).  Returns alpha (M, V) f32."""
    M, D2 = mention_span.shape
    d_ent, V = entity_emb_weight.shape

    # Tile sizes: sublane-dense M tiles, lane-dense V tiles.
    TM = min(tm_target, _round_up(M, 8))
    M_pad = _round_up(M, TM)
    TV = min(tv_target, _round_up(V, 128))
    V_pad = _round_up(V, TV)

    span = mention_span
    if M_pad != M:
        span = jnp.pad(span, ((0, M_pad - M), (0, 0)))
    emb = entity_emb_weight
    if V_pad != V:
        emb = jnp.pad(emb, ((0, 0), (0, V_pad - V)))

    # bf16 MXU inputs (f32 accumulation inside the kernel); bias stays f32.
    span_c = span.astype(compute_dtype)
    w1_c = w1_t.astype(compute_dtype)
    emb_c = emb.astype(compute_dtype)
    b1_2d = b1.reshape(1, -1).astype(jnp.float32)

    grid = (M_pad // TM, 2, V_pad // TV)

    kernel = functools.partial(
        _entity_head_kernel,
        tv=TV, v_actual=V, v_padded=V_pad,
        compute_dtype=compute_dtype,
        approx_recip=(compute_dtype == jnp.bfloat16),
    )

    in_specs = [
        pl.BlockSpec((TM, D2), lambda m, p, v: (m, 0)),       # span: resident per M tile
        pl.BlockSpec((D2, d_ent), lambda m, p, v: (0, 0)),    # W1: resident
        pl.BlockSpec((1, d_ent), lambda m, p, v: (0, 0)),     # b1: resident
        pl.BlockSpec((d_ent, TV), lambda m, p, v: (0, v)),    # E: streamed over V
    ]
    # Phase 0 pins the output to block (m, 0) (never written there), so alpha is
    # only DMA'd to HBM once, during phase 1.
    out_specs = pl.BlockSpec((TM, TV), lambda m, p, v: (m, p * v))

    itemsize_c = jnp.dtype(compute_dtype).itemsize
    m_tiles = M_pad // TM
    flops = int(2 * M_pad * D2 * d_ent + 2 * 2 * M_pad * d_ent * V_pad)
    transcendentals = int(2 * M_pad * V_pad)
    bytes_accessed = int(
        M_pad * D2 * itemsize_c
        + D2 * d_ent * itemsize_c
        + d_ent * 4
        + 2 * m_tiles * d_ent * V_pad * itemsize_c   # E streamed twice per M tile
        + M_pad * V_pad * 4                          # alpha write
    )

    # VMEM budget: double-buffered E/out tiles + resident span/W1 + scratch.
    est_vmem = (
        2 * d_ent * max(TV, 128) * itemsize_c
        + 2 * TM * max(TV, 128) * 4
        + 2 * TM * max(D2, 128) * itemsize_c
        + 2 * max(D2, 8) * max(d_ent, 128) * itemsize_c
        + TM * max(d_ent, 128) * 4
        + 2 * TM * 128 * 4
    )
    vmem_limit_bytes = int(min(max(4 * est_vmem, 16 * 2 ** 20), 48 * 2 ** 20))

    alpha_pad = pl.pallas_call(
        kernel,
        out_shape=jax.ShapeDtypeStruct((M_pad, V_pad), jnp.float32),
        grid_spec=pltpu.PrefetchScalarGridSpec(
            num_scalar_prefetch=0,
            grid=grid,
            in_specs=in_specs,
            out_specs=out_specs,
            scratch_shapes=[
                pltpu.VMEM((TM, d_ent), jnp.float32),   # pseudo entity embedding
                pltpu.VMEM((TM, 1), jnp.float32),       # running max
                pltpu.VMEM((TM, 1), jnp.float32),       # running sum of exp
            ],
        ),
        compiler_params=pltpu.CompilerParams(
            dimension_semantics=("parallel", "arbitrary", "arbitrary"),
            vmem_limit_bytes=vmem_limit_bytes,
        ),
        cost_estimate=pl.CostEstimate(
            flops=flops, transcendentals=transcendentals,
            bytes_accessed=bytes_accessed),
    )(span_c, w1_c, b1_2d, emb_c)

    return alpha_pad[:M, :V]


# -------------- host-side glue: BIO position parsing + span gather ---------------


def compute_positions(bio_np):
    """Vectorized, bug-compatible replica of the torch position parsing
    (including the `end = N-2` fall-through when the INNER run reaches the
    sequence end or the mention begins at the last token)."""
    begin_positions = np.argwhere(bio_np == BEGIN)          # (M, 2) -> (batch, token)
    if len(begin_positions) == 0:
        return None
    _, N = bio_np.shape
    b_idx = begin_positions[:, 0]
    j_idx = begin_positions[:, 1]
    not_inner = (bio_np != INNER)[b_idx]                    # (M, N)
    after = np.arange(N)[None, :] > j_idx[:, None]          # (M, N)
    cand = not_inner & after
    has = cand.any(axis=1)
    first_not_inner = np.where(has, cand.argmax(axis=1), N - 1)
    end_positions = (first_not_inner - 1)[:, None]
    positions = np.concatenate([begin_positions, end_positions], axis=1).T  # (3, M)
    return positions


def forward(X, bio_output, w1_t, b1, entity_emb_weight, *,
            compute_dtype=jnp.bfloat16):
    # TODO(synk): position parsing & span gather stay on host because M (number
    # of mentions) is data-dependent; with M bucketing the row indices could be
    # fed as scalar-prefetch args and gathered inside the kernel instead.
    bio_np = np.asarray(bio_output)
    positions = compute_positions(bio_np)
    if positions is None:
        # Matches the torch early-return shape (rank-1, size 1).
        return jnp.zeros((1,), jnp.float32)
    first = X[positions[0], positions[1]]   # (M, D)
    second = X[positions[0], positions[2]]  # (M, D)
    mention_span = jnp.concatenate([first, second], axis=1)  # (M, 2*D)
    return entity_prediction_head_alpha(
        mention_span, w1_t, b1, entity_emb_weight, compute_dtype=compute_dtype)


if __name__ == "__main__":
    # Small shapes consistent with the module
    B, N = 2, 16
    encoder_embed_dim = 32
    entity_embed_dim = 16
    entity_vocab_size = 64

    key = jax.random.PRNGKey(0)
    k_x, k_w1, k_b1, k_emb = jax.random.split(key, 4)

    X = jax.random.normal(k_x, (B, N, encoder_embed_dim), dtype=jnp.float32)

    # Deterministic BIO tags: a few begin/inner mentions
    bio = np.zeros((B, N), dtype=np.int32)
    bio[0, 2] = BEGIN; bio[0, 3] = INNER; bio[0, 4] = INNER
    bio[0, 8] = BEGIN
    bio[1, 1] = BEGIN; bio[1, 2] = INNER
    bio[1, 10] = BEGIN; bio[1, 11] = INNER; bio[1, 12] = INNER; bio[1, 13] = INNER

    # Parameters (deterministic init).  hidden_to_entity: Linear(2*D, d_ent);
    # weight kept pre-transposed to (2*D, d_ent) for the kernel matmul.
    w1_t = jax.random.normal(
        k_w1, (2 * encoder_embed_dim, entity_embed_dim), dtype=jnp.float32) * 0.05
    b1 = jax.random.normal(k_b1, (entity_embed_dim,), dtype=jnp.float32) * 0.05
    # entity_embedding.weight as consumed by `pseudo.matmul(weight)`: (d_ent, V)
    entity_emb_weight = jax.random.normal(
        k_emb, (entity_embed_dim, entity_vocab_size), dtype=jnp.float32) * 0.05

    # Fast (bf16 MXU) path and full-f32 path.
    alpha_bf16 = forward(X, bio, w1_t, b1, entity_emb_weight,
                         compute_dtype=jnp.bfloat16)
    alpha_f32 = forward(X, bio, w1_t, b1, entity_emb_weight,
                        compute_dtype=jnp.float32)
    alpha_bf16, alpha_f32 = jax.block_until_ready((alpha_bf16, alpha_f32))

    # Pure-JAX reference check
    positions = compute_positions(bio)
    first = X[positions[0], positions[1]]
    second = X[positions[0], positions[2]]
    span = jnp.concatenate([first, second], axis=1)
    ref = jax.nn.softmax(jnp.dot(jnp.dot(span, w1_t) + b1, entity_emb_weight), axis=1)
    ref = np.asarray(ref)

    M = positions.shape[1]
    assert alpha_f32.shape == (M, entity_vocab_size)
    assert alpha_bf16.shape == (M, entity_vocab_size)
    np.testing.assert_allclose(np.asarray(alpha_f32), ref, atol=1e-5, rtol=1e-5)
    np.testing.assert_allclose(np.asarray(alpha_bf16), ref, atol=3e-3, rtol=3e-2)

    print("KERNEL_OK")
</pallas_src>

<mosaic_0001>
module attributes {stable_mosaic.version = 11 : i64} {
  func.func @_entity_head_kernel(%arg0: i32, %arg1: i32, %arg2: i32, %arg3: memref<8x64xbf16, #tpu.memory_space<vmem>>, %arg4: memref<64x16xbf16, #tpu.memory_space<vmem>>, %arg5: memref<1x16xf32, #tpu.memory_space<vmem>>, %arg6: memref<16x128xbf16, #tpu.memory_space<vmem>>, %arg7: memref<8x128xf32, #tpu.memory_space<vmem>>, %arg8: memref<8x16xf32, #tpu.memory_space<vmem>>, %arg9: memref<8x1xf32, #tpu.memory_space<vmem>>, %arg10: memref<8x1xf32, #tpu.memory_space<vmem>>) attributes {dimension_semantics = [#tpu.dimension_semantics<parallel>, #tpu.dimension_semantics<arbitrary>, #tpu.dimension_semantics<arbitrary>], iteration_bounds = array<i64: 1, 2, 1>, scalar_prefetch = 0 : i64, scratch_operands = 3 : i64, tpu.core_type = #tpu.core_type<tc>, window_params = [{transform_indices = @transform_0, window_bounds = array<i64: 8, 64>}, {pipeline_mode = #tpu.pipeline_mode<synchronous>, transform_indices = @transform_1, window_bounds = array<i64: 64, 16>}, {pipeline_mode = #tpu.pipeline_mode<synchronous>, transform_indices = @transform_2, window_bounds = array<i64: 1, 16>}, {transform_indices = @transform_3, window_bounds = array<i64: 16, 128>}, {transform_indices = @transform_4, window_bounds = array<i64: 8, 128>}]} {
    %c0_i32 = arith.constant 0 : i32
    %0 = arith.cmpi eq, %arg1, %c0_i32 : i32
    %c0_i32_0 = arith.constant 0 : i32
    %1 = arith.cmpi eq, %arg2, %c0_i32_0 : i32
    %2 = arith.andi %0, %1 : i1
    %3 = arith.extui %2 : i1 to i32
    %c0_i32_1 = arith.constant 0 : i32
    %4 = arith.cmpi ne, %3, %c0_i32_1 : i32
    scf.if %4 {
      %c0 = arith.constant 0 : index
      %c0_5 = arith.constant 0 : index
      %11 = vector.load %arg3[%c0, %c0_5] : memref<8x64xbf16, #tpu.memory_space<vmem>>, vector<8x64xbf16>
      %c0_6 = arith.constant 0 : index
      %c0_7 = arith.constant 0 : index
      %12 = vector.load %arg4[%c0_6, %c0_7] : memref<64x16xbf16, #tpu.memory_space<vmem>>, vector<64x16xbf16>
      %cst = arith.constant dense<0.000000e+00> : vector<8x16xf32>
      %13 = tpu.matmul %11, %12, %cst {dimension_numbers = #tpu.dot_dimension_numbers<[1], [0], [0], [1], [0, 0, 1, 1], [], []>} : vector<8x64xbf16>, vector<64x16xbf16>, vector<8x16xf32> -> vector<8x16xf32>
      %c0_8 = arith.constant 0 : index
      %c0_9 = arith.constant 0 : index
      %14 = vector.load %arg5[%c0_8, %c0_9] : memref<1x16xf32, #tpu.memory_space<vmem>>, vector<1x16xf32>
      %15 = vector.broadcast %14 : vector<1x16xf32> to vector<8x16xf32>
      %16 = arith.addf %13, %15 : vector<8x16xf32>
      %c0_10 = arith.constant 0 : index
      %c0_11 = arith.constant 0 : index
      %17 = vector.load %arg8[%c0_10, %c0_11] : memref<8x16xf32, #tpu.memory_space<vmem>>, vector<8x16xf32>
      tpu.vector_store %arg8[%c0_10, %c0_11], %16 {strides = array<i32>} : memref<8x16xf32, #tpu.memory_space<vmem>>, vector<8x16xf32>,
      %cst_12 = arith.constant 0xFF800000 : f32
      %18 = vector.broadcast %cst_12 : f32 to vector<8x1xf32>
      %c0_13 = arith.constant 0 : index
      %c0_14 = arith.constant 0 : index
      %19 = vector.load %arg9[%c0_13, %c0_14] : memref<8x1xf32, #tpu.memory_space<vmem>>, vector<8x1xf32>
      tpu.vector_store %arg9[%c0_13, %c0_14], %18 {strides = array<i32>} : memref<8x1xf32, #tpu.memory_space<vmem>>, vector<8x1xf32>,
      %cst_15 = arith.constant 0.000000e+00 : f32
      %20 = vector.broadcast %cst_15 : f32 to vector<8x1xf32>
      %c0_16 = arith.constant 0 : index
      %c0_17 = arith.constant 0 : index
      %21 = vector.load %arg10[%c0_16, %c0_17] : memref<8x1xf32, #tpu.memory_space<vmem>>, vector<8x1xf32>
      tpu.vector_store %arg10[%c0_16, %c0_17], %20 {strides = array<i32>} : memref<8x1xf32, #tpu.memory_space<vmem>>, vector<8x1xf32>,
    } else {
    }
    %c0_i32_2 = arith.constant 0 : i32
    %5 = arith.cmpi eq, %arg1, %c0_i32_2 : i32
    %6 = arith.extui %5 : i1 to i32
    %c0_i32_3 = arith.constant 0 : i32
    %7 = arith.cmpi ne, %6, %c0_i32_3 : i32
    scf.if %7 {
      %c0 = arith.constant 0 : index
      %c0_5 = arith.constant 0 : index
      %11 = vector.load %arg8[%c0, %c0_5] : memref<8x16xf32, #tpu.memory_space<vmem>>, vector<8x16xf32>
      %12 = arith.truncf %11 : vector<8x16xf32> to vector<8x16xbf16>
      %c0_6 = arith.constant 0 : index
      %c0_7 = arith.constant 0 : index
      %13 = vector.load %arg6[%c0_6, %c0_7] : memref<16x128xbf16, #tpu.memory_space<vmem>>, vector<16x128xbf16>
      %cst = arith.constant dense<0.000000e+00> : vector<8x128xf32>
      %14 = tpu.matmul %12, %13, %cst {dimension_numbers = #tpu.dot_dimension_numbers<[1], [0], [0], [1], [0, 0, 1, 1], [], []>} : vector<8x16xbf16>, vector<16x128xbf16>, vector<8x128xf32> -> vector<8x128xf32>
      %c128_i32 = arith.constant 128 : i32
      %15 = arith.muli %arg2, %c128_i32 : i32
      %16 = tpu.iota {dimensions = array<i32: 1>} : vector<8x128xi32>
      %17 = vector.broadcast %15 : i32 to vector<8x128xi32>
      %18 = arith.addi %17, %16 : vector<8x128xi32>
      %c64_i32 = arith.constant 64 : i32
      %19 = vector.broadcast %c64_i32 : i32 to vector<8x128xi32>
      %20 = arith.cmpi slt, %18, %19 : vector<8x128xi32>
      %cst_8 = arith.constant 0xFF800000 : f32
      %21 = vector.broadcast %cst_8 : f32 to vector<8x128xf32>
      %22 = arith.select %20, %14, %21 : vector<8x128xi1>, vector<8x128xf32>
      %c0_9 = arith.constant 0 : index
      %c0_10 = arith.constant 0 : index
      %23 = vector.load %arg9[%c0_9, %c0_10] : memref<8x1xf32, #tpu.memory_space<vmem>>, vector<8x1xf32>
      %cst_11 = arith.constant dense<0xFF800000> : vector<8xf32>
      %24 = vector.multi_reduction <maximumf>, %22, %cst_11 [1] : vector<8x128xf32> to vector<8xf32>
      %25 = vector.shape_cast %24 : vector<8xf32> to vector<8x1xf32>
      %26 = arith.maximumf %23, %25 : vector<8x1xf32>
      %c0_12 = arith.constant 0 : index
      %c0_13 = arith.constant 0 : index
      %27 = vector.load %arg10[%c0_12, %c0_13] : memref<8x1xf32, #tpu.memory_space<vmem>>, vector<8x1xf32>
      %c0_14 = arith.constant 0 : index
      %c0_15 = arith.constant 0 : index
      %28 = vector.load %arg9[%c0_14, %c0_15] : memref<8x1xf32, #tpu.memory_space<vmem>>, vector<8x1xf32>
      %29 = arith.subf %28, %26 : vector<8x1xf32>
      %30 = math.exp %29 : vector<8x1xf32>
      %31 = arith.mulf %27, %30 : vector<8x1xf32>
      %32 = vector.broadcast %26 : vector<8x1xf32> to vector<8x128xf32>
      %33 = arith.subf %22, %32 : vector<8x128xf32>
      %34 = math.exp %33 : vector<8x128xf32>
      %cst_16 = arith.constant dense<0.000000e+00> : vector<8xf32>
      %35 = vector.multi_reduction <add>, %34, %cst_16 [1] : vector<8x128xf32> to vector<8xf32>
      %36 = vector.shape_cast %35 : vector<8xf32> to vector<8x1xf32>
      %37 = arith.addf %31, %36 : vector<8x1xf32>
      %c0_17 = arith.constant 0 : index
      %c0_18 = arith.constant 0 : index
      %38 = vector.load %arg10[%c0_17, %c0_18] : memref<8x1xf32, #tpu.memory_space<vmem>>, vector<8x1xf32>
      tpu.vector_store %arg10[%c0_17, %c0_18], %37 {strides = array<i32>} : memref<8x1xf32, #tpu.memory_space<vmem>>, vector<8x1xf32>,
      %c0_19 = arith.constant 0 : index
      %c0_20 = arith.constant 0 : index
      %39 = vector.load %arg9[%c0_19, %c0_20] : memref<8x1xf32, #tpu.memory_space<vmem>>, vector<8x1xf32>
      tpu.vector_store %arg9[%c0_19, %c0_20], %26 {strides = array<i32>} : memref<8x1xf32, #tpu.memory_space<vmem>>, vector<8x1xf32>,
    } else {
    }
    %c1_i32 = arith.constant 1 : i32
    %8 = arith.cmpi eq, %arg1, %c1_i32 : i32
    %9 = arith.extui %8 : i1 to i32
    %c0_i32_4 = arith.constant 0 : i32
    %10 = arith.cmpi ne, %9, %c0_i32_4 : i32
    scf.if %10 {
      %c0 = arith.constant 0 : index
      %c0_5 = arith.constant 0 : index
      %11 = vector.load %arg8[%c0, %c0_5] : memref<8x16xf32, #tpu.memory_space<vmem>>, vector<8x16xf32>
      %12 = arith.truncf %11 : vector<8x16xf32> to vector<8x16xbf16>
      %c0_6 = arith.constant 0 : index
      %c0_7 = arith.constant 0 : index
      %13 = vector.load %arg6[%c0_6, %c0_7] : memref<16x128xbf16, #tpu.memory_space<vmem>>, vector<16x128xbf16>
      %cst = arith.constant dense<0.000000e+00> : vector<8x128xf32>
      %14 = tpu.matmul %12, %13, %cst {dimension_numbers = #tpu.dot_dimension_numbers<[1], [0], [0], [1], [0, 0, 1, 1], [], []>} : vector<8x16xbf16>, vector<16x128xbf16>, vector<8x128xf32> -> vector<8x128xf32>
      %c128_i32 = arith.constant 128 : i32
      %15 = arith.muli %arg2, %c128_i32 : i32
      %16 = tpu.iota {dimensions = array<i32: 1>} : vector<8x128xi32>
      %17 = vector.broadcast %15 : i32 to vector<8x128xi32>
      %18 = arith.addi %17, %16 : vector<8x128xi32>
      %c64_i32 = arith.constant 64 : i32
      %19 = vector.broadcast %c64_i32 : i32 to vector<8x128xi32>
      %20 = arith.cmpi slt, %18, %19 : vector<8x128xi32>
      %cst_8 = arith.constant 0xFF800000 : f32
      %21 = vector.broadcast %cst_8 : f32 to vector<8x128xf32>
      %22 = arith.select %20, %14, %21 : vector<8x128xi1>, vector<8x128xf32>
      %c0_9 = arith.constant 0 : index
      %c0_10 = arith.constant 0 : index
      %23 = vector.load %arg9[%c0_9, %c0_10] : memref<8x1xf32, #tpu.memory_space<vmem>>, vector<8x1xf32>
      %24 = vector.broadcast %23 : vector<8x1xf32> to vector<8x128xf32>
      %25 = arith.subf %22, %24 : vector<8x128xf32>
      %26 = math.exp %25 : vector<8x128xf32>
      %c0_11 = arith.constant 0 : index
      %c0_12 = arith.constant 0 : index
      %27 = vector.load %arg10[%c0_11, %c0_12] : memref<8x1xf32, #tpu.memory_space<vmem>>, vector<8x1xf32>
      %28 = tpu.reciprocal %27 {approx = true} : vector<8x1xf32> -> vector<8x1xf32>
      %29 = vector.broadcast %28 : vector<8x1xf32> to vector<8x128xf32>
      %30 = arith.mulf %26, %29 : vector<8x128xf32>
      %c0_13 = arith.constant 0 : index
      %c0_14 = arith.constant 0 : index
      %31 = vector.load %arg7[%c0_13, %c0_14] : memref<8x128xf32, #tpu.memory_space<vmem>>, vector<8x128xf32>
      tpu.vector_store %arg7[%c0_13, %c0_14], %30 {strides = array<i32>} : memref<8x128xf32, #tpu.memory_space<vmem>>, vector<8x128xf32>,
    } else {
    }
    return
  }
  func.func @transform_0(%arg0: i32, %arg1: i32, %arg2: i32) -> (i32, i32) {
    %c0_i32 = arith.constant 0 : i32
    %c0_i32_0 = arith.constant 0 : i32
    return %arg0, %c0_i32 : i32, i32
  }
  func.func @transform_1(%arg0: i32, %arg1: i32, %arg2: i32) -> (i32, i32) {
    %c0_i32 = arith.constant 0 : i32
    %c0_i32_0 = arith.constant 0 : i32
    %c0_i32_1 = arith.constant 0 : i32
    return %c0_i32, %c0_i32_0 : i32, i32
  }
  func.func @transform_2(%arg0: i32, %arg1: i32, %arg2: i32) -> (i32, i32) {
    %c0_i32 = arith.constant 0 : i32
    %c0_i32_0 = arith.constant 0 : i32
    %c0_i32_1 = arith.constant 0 : i32
    return %c0_i32, %c0_i32_0 : i32, i32
  }
  func.func @transform_3(%arg0: i32, %arg1: i32, %arg2: i32) -> (i32, i32) {
    %c0_i32 = arith.constant 0 : i32
    %c0_i32_0 = arith.constant 0 : i32
    return %c0_i32, %arg2 : i32, i32
  }
  func.func @transform_4(%arg0: i32, %arg1: i32, %arg2: i32) -> (i32, i32) {
    %0 = arith.muli %arg1, %arg2 : i32
    %c0_i32 = arith.constant 0 : i32
    return %arg0, %0 : i32, i32
  }
}

</mosaic_0001>

<bundles_post_ra>
// kernel: tpu_custom_call.1
= control target key start
LH: loop header
LB: loop body
LE: loop exit
PB: predicated region body
PF: predicated region fallthrough
CT: control target
= control target key end

     0   :  { %9 = vsyncpa [#allocation6], 0  ;;  %s886_s0 = inlined_call_operand.vmem [shape: bf16[8,64], index: 0, kind: input, shape index: {}]   ;;  %s887_s1 = inlined_call_operand.vmem [shape: bf16[64,16], index: 1, kind: input, shape index: {}]   ;;  %s888_s2 = inlined_call_operand.vmem [shape: f32[1,16], index: 2, kind: input, shape index: {}]   ;;  %s889_s3 = inlined_call_operand.vmem [shape: bf16[16,128], index: 3, kind: input, shape index: {}]   ;;  %s890_s4 = inlined_call_operand.hbm [shape: f32[8,128], index: 4, kind: output, shape index: {}]  }
   0x1   :  { %11 = vsyncpa [#allocation6 + $0x1], 0  ;;  %s810_s15 = smov 0   ;;  %s812_s16 = smov 0  }
   0x2   :  { %s814_s17 = smov 0  }
   0x3 LB: > { %s605_s18 = sadd.s32 4294967295, %s773_s17   ;;  %s606_s19 = sadd.s32 4294967294, %s773_s17   ;;  %s773_s17 = sphi %s814_s17, %s17_s17   ;;  %s769_s16 = sphi %s812_s16, %s893_s16   ;;  %s765_s15 = sphi %s810_s15, %s892_s15  }
   0x4   : > { %s32_s20 = sadd.s32 1, %s769_s16  ;;  %p610_p0 = scmp.ge.s32.totalorder %s773_s17, 1 }
   0x5   : > { %p34_p1 = scmp.ge.s32.totalorder %s32_s20, 2  ;;  %p196_p2 = scmp.lt.s32.totalorder %s773_s17, 3 }
   0x7   : > { %s895_s20 = smov (%p34_p1, %s32_s20), 0  ;;  %p197_p3 = pnand %p610_p0, %p196_p2 }
   0x8   : > { %p235_p4 = scmp.eq.s32.totalorder (!%p197_p3), %s765_s15, 0 }
   0x9   : > { %200 = sbr.rel (%p197_p3) target bundleno = 1099 (0x44b), region = 36 }
   0xe   : > { %240 = sbr.rel (!%p235_p4) target bundleno = 230 (0xe6), region = 40  ;;  %vm327_vm0 = vcmask (%p235_p4), 7168   ;;  %v707_v0 = vld [vmem:[%s887_s1 + $0x18] sm:$0xff] (%p235_p4)   ;;  %v775_v1 = vmov (%p235_p4), 0.0   ;;  %v776_v2 = vmov (%p235_p4), -inf   ;;  %v708_v3 = vld [vmem:[%s887_s1 + $0x10] sm:$0xff] (%p235_p4)  }
   0xf   : > { %638 = vmatprep.subr.bf16.mxu0 (%p235_p4), %v775_v1  ;;  %328 = vst.msk [vmem:[#allocation3] sm:$0xff] (%p235_p4), %vm327_vm0, %v776_v2  ;;  %329 = vst.msk [vmem:[#allocation4] sm:$0xff] (%p235_p4), %vm327_vm0, %v775_v1  ;;  %vm777_vm1 = vmmov (%p235_p4), 0   ;;  %v709_v4 = vld [vmem:[%s887_s1 + $0x8] sm:$0xff] (%p235_p4)   ;;  %v710_v5 = vld [vmem:[%s887_s1] sm:$0xff] (%p235_p4)   ;;  %vm281_vm2 = vcmask (%p235_p4), 523264  }
  0x10   : > { %639 = vmatpush3.bf16.msra.mxu0 (%p235_p4), %v707_v0  ;;  %646 = vmatprep.mubr.msk.bf16.mxu0 (%p235_p4), %vm777_vm1, %v775_v1  ;;  %v241_v6 = vld [vmem:[%s886_s0] sm:$0xf] (%p235_p4)  ;;  %vm325_vm3 = vcmask (%p235_p4), 130048  }
  0x11   : > { %640 = vmatprep.subr.bf16.mxu0 (%p235_p4), %v775_v1  ;;  %v612_v7 = vld [vmem:[%s888_s2] ss:$0 sm:$0xff] (%p235_p4) }
  0x14   : > { %641 = vmatpush3.bf16.msra.mxu0 %v708_v3 }
  0x15   : > { %642 = vmatprep.subr.bf16.mxu0 %v775_v1 }
  0x18   : > { %643 = vmatpush3.bf16.msra.mxu0 %v709_v4 }
  0x19   : > { %644 = vmatprep.subr.bf16.mxu0 %v775_v1 }
  0x1c   : > { %645 = vmatpush3.bf16.msra.mxu0 %v710_v5 }
  0x1f   : > { %647 = vmatmul.mubr.msk.bf16.vlgmr.msra.gmra.mxu0 %vm281_vm2, %v241_v6 }
  0xdf   : > { %v319_v8 = vpop.f32.mrf.mxu0 }
  0xe0   : > { %v320_v9 = vadd.f32 %v612_v7, %v319_v8 }
  0xe1   : > { %v648_v10 = vpop.f32.mrf.mxu0 }
  0xe2   : > { %326 = vst.msk [vmem:[#allocation2] sm:$0xff] %vm325_vm3, %v320_v9 }
  0xe3   : > { %v322_v11 = vpop.f32.mrf.mxu0 }
  0xe5   : > { %v649_v12 = vpop.f32.mrf.mxu0 }
  0xe6 PF: > { %p618_p5 = scmp.ne.s32.totalorder %s765_s15, 0 }
  0xe8   : > { %332 = sbr.rel (%p618_p5) target bundleno = 859 (0x35b), region = 44 }
  0xed   : > { %v712_v13 = vld [vmem:[%s889_s3] sm:$0xff]   ;;  %v778_v14 = vmov 0.0   ;;  %vm779_vm4 = vmmov 0   ;;  %vm343_vm5 = vcmask 130048   ;;  %v388_v17 = vlaneseq  ;;  %v394_v25 = vld [vmem:[#allocation3] sm:$0xff]  ;;  %v398_v35 = vld [vmem:[#allocation4] sm:$0xff] }
  0xee   : > { %650 = vmatprep.subr.bf16.mxu0 %v778_v14  ;;  %v333_v15 = vld [vmem:[#allocation2] sm:$0xff]  ;;  %652 = vmatprep.mubr.msk.bf16.mxu0 %vm779_vm4, %v778_v14  ;;  %v780_v24 = vmov 0   ;;  %vm414_vm7 = vcmask 7168  }
  0xef   : > { %651 = vmatpush3.bf16.msra.mxu0 %v712_v13  ;;  %v334_v16 = vpack.c.bf16 %v333_v15, %v333_v15  ;;  %v389_v18 = vand.u32 127, %v388_v17  ;;  %711 = vset.pattern.permute.xlu0 %v780_v24 }
  0xf1   : > { %vm392_vm6 = vcmp.lt.s32.totalorder %v389_v18, 64 }
  0xf2   : > { %653 = vmatmul.mubr.msk.bf16.vlgmr.msra.gmra.mxu0 %vm343_vm5, %v334_v16 }
 0x1b2   : > { %v381_v19 = vpop.f32.mrf.mxu0 }
 0x1b3   : > { %v393_v20 = vsel %vm392_vm6, %v381_v19, -inf }
 0x1b4   : > { %395 = vmax.xlane.f32.xlu0 %v393_v20  ;;  %v654_v21 = vpop.f32.mrf.mxu0 }
 0x1b6   : > { %v384_v22 = vpop.f32.mrf.mxu0 }
 0x1b8   : > { %v655_v23 = vpop.f32.mrf.mxu0 }
 0x23d   : > { %v396_v26 = vpop.xlane.xlu0 %395 }
 0x23e   : > { %v397_v27 = vmax.f32 %v394_v25, %v396_v26 }
 0x240   : > { %v399_v28 = vsub.f32 %v394_v25, %v397_v27  ;;  %416 = vst.msk [vmem:[#allocation3] sm:$0xff] %vm414_vm7, %v397_v27  ;;  %405 = vperm.xlu0 %711, %v397_v27  }
 0x242   : > { %v400_v33 = vmul.f32 1.442695, %v399_v28 }
 0x2bb   : > { %v406_v29 = vpop.permute.xlu0 %405 }
 0x2bc   : > { %v408_v30 = vsub.f32 %v393_v20, %v406_v29 }
 0x2be   : > { %v409_v31 = vmul.f32 1.442695, %v408_v30 }
 0x2c0   : > { %713 = vpow2.f32 %v409_v31 }
 0x2c1   : > { %715 = vpow2.f32 %v400_v33 }
 0x2cd   : > { %v714_v32 = vpop.eup %713 }
 0x2ce   : > { %411 = vadd.xlane.f32.xlu1 %v714_v32  ;;  %v716_v34 = vpop.eup %715 }
 0x2cf   : > { %v402_v36 = vmul.f32 %v716_v34, %v398_v35 }
 0x357   : > { %v412_v37 = vpop.xlane.xlu1 %411 }
 0x358   : > { %v413_v38 = vadd.f32 %v412_v37, %v402_v36 }
 0x35a   : > { %415 = vst.msk [vmem:[#allocation4] sm:$0xff] %vm414_vm7, %v413_v38 }
 0x35b PF: > { %p621_p6 = scmp.ne.s32.totalorder %s765_s15, 1 }
 0x35d   : > { %420 = sbr.rel (%p621_p6) target bundleno = 1086 (0x43e), region = 48 }
 0x362   : > { %v718_v39 = vld [vmem:[%s889_s3] sm:$0xff]   ;;  %v781_v40 = vmov 0.0   ;;  %v482_v42 = vld [vmem:[#allocation3] sm:$0xff]  ;;  %v491_v43 = vld [vmem:[#allocation4] sm:$0xff]  ;;  %vm782_vm8 = vmmov 0   ;;  %vm431_vm9 = vcmask 130048   ;;  %v476_v47 = vlaneseq }
 0x363   : > { %656 = vmatprep.subr.bf16.mxu0 %v781_v40  ;;  %v421_v41 = vld [vmem:[#allocation2] sm:$0xff]  ;;  %658 = vmatprep.mubr.msk.bf16.mxu0 %vm782_vm8, %v781_v40  ;;  %719 = vrcp.f32 %v491_v43  ;;  %v783_v45 = vmov 0  }
 0x364   : > { %657 = vmatpush3.bf16.msra.mxu0 %v718_v39  ;;  %v422_v44 = vpack.c.bf16 %v421_v41, %v421_v41  ;;  %717 = vset.pattern.permute.xlu0 %v783_v45  ;;  %v477_v48 = vand.u32 127, %v476_v47 }
 0x365   : > { %485 = vperm.xlu0 %717, %v482_v42  }
 0x366   : > { %vm480_vm10 = vcmp.lt.s32.totalorder %v477_v48, 64 }
 0x367   : > { %659 = vmatmul.mubr.msk.bf16.vlgmr.msra.gmra.mxu0 %vm431_vm9, %v422_v44 }
 0x370   : > { %v720_v46 = vpop.eup %719 }
 0x371   : > { %495 = vperm.xlu0 %717, %v720_v46  }
 0x3e0   : > { %v486_v50 = vpop.permute.xlu0 %485 }
 0x3ec   : > { %v496_v58 = vpop.permute.xlu0 %495 }
 0x427   : > { %v469_v49 = vpop.f32.mrf.mxu0 }
 0x428   : > { %v481_v51 = vsel %vm480_vm10, %v469_v49, -inf }
 0x429   : > { %v488_v52 = vsub.f32 %v481_v51, %v486_v50  ;;  %v660_v53 = vpop.f32.mrf.mxu0 }
 0x42b   : > { %v489_v54 = vmul.f32 1.442695, %v488_v52  ;;  %v472_v55 = vpop.f32.mrf.mxu0 }
 0x42d   : > { %721 = vpow2.f32 %v489_v54  ;;  %v661_v56 = vpop.f32.mrf.mxu0 }
 0x43a   : > { %v722_v57 = vpop.eup %721 }
 0x43b   : > { %v498_v59 = vmul.f32 %v722_v57, %v496_v58 }
 0x43d   : > { %499 = vst [vmem:[#allocation5] sm:$0xff] %v498_v59 }
 0x43e PF: > { %p863_p7 = scmp.eq.s32.totalorder %s605_s18, 1  ;;  %s784_s12 = smov [#allocation5]  }
 0x43f   : > { %s516_s13 = sshll.u32 %s784_s12, 4  ;;  %s517_s13 = int_to_ptr.vmem [resolvable:$true] %s516_s13 }
 0x440   : > { %s723_s14 = scalar_lea.vmem %s517_s13, 128  ;;  %s729_s15 = scalar_lea.vmem %s517_s13, 256 }
 0x441   : > { %p724_p8 = scmp.ne.s32.totalorder %s517_s13, %s723_s14  ;;  %p730_p11 = scmp.lt.s32.totalorder %s517_s13, %s517_s13 }
 0x442   : > { %p731_p12 = scmp.lt.s32.totalorder %s729_s15, %s723_s14 }
 0x443   : > { %p725_p9 = pnand %p724_p8, %p863_p7 }
 0x444   : > { %p732_p13 = por %p731_p12, %p730_p11 }
 0x445   : > { %p726_p10 = pneg %p725_p9 }
 0x447   : > { %p733_p0 = pnand %p732_p13, %p726_p10 }
 0x449   : > { %736 = shalt.err (!%p733_p0)
}
 0x44a   : > { %663 = dma.vmem_to_hbm [thread:$0]  (%p863_p7), %s517_s13, 128, %s890_s4, [#allocation6]  }
 0x44b PF: > { %p671_p1 = scmp.ge.s32.totalorder %s773_s17, 2  ;;  %p672_p2 = scmp.eq.s32.totalorder %s606_s19, 1 }
 0x44d   : > { %p667_p3 = pnand %p672_p2, %p671_p1 }
 0x44f   : > { %p668_p4 = pneg %p667_p3 }
 0x451   : > { %760 = dma.done.wait (%p668_p4), [#allocation6], 128  }
 0x452   : > { %762 = vsyncadd (%p668_p4), [#allocation6], 4294967168  ;;  %s17_s17 = sadd.s32 1, %s773_s17   ;;  %s892_s15 = smov %s769_s16 }
 0x453   : > { %p14_p5 = scmp.ge.s32.totalorder %s17_s17, 4   ;;  %s893_s16 = smov %s895_s20 }
 0x455   :  { %16 = sbr.rel (!%p14_p5) target bundleno = 3 (0x3), region = 86 }
 0x45a   :  { %534 = vsyncpa [#allocation6], 1 }
 0x45b   :  { %536 = vsyncpa [#allocation6 + $0x1], 1 }

</bundles_post_ra>
